<compile_context>
chip_gen: v6e
topology: v6e:2x2x1
jax: 0.10.0
libtpu: 0.0.40
codegen_flags: <defaults>
</compile_context>

<pallas_src>
import numpy as np
import jax
import jax.numpy as jnp
from jax.experimental import pallas as pl
from jax.experimental.pallas import tpu as pltpu

SUBLANES = 8    # f32 sublane tile height
LANES = 128     # lane width


def gru_kernel(x_ref, wih_ref, whh_ref, bih_ref, bhn_ref, out_ref):
    """GRU recurrence over T-1 steps (the discarded last step is never computed).

    x_ref   : ((T-1)*Bp, Din)  time-major rows, batch padded to the sublane width
    wih_ref : (Din, 3H)        fused input->gate weights  [r | z | n]
    whh_ref : (H, 3H)          fused hidden->gate weights [r | z | n]
    bih_ref : (1, 3H)          fused biases [b_ir+b_hr | b_iz+b_hz | b_in]
    bhn_ref : (1, H)           n-gate hidden bias (stays inside the r product)
    out_ref : (Bp, (T-1)*S)    S = 128-aligned per-step lane stride
    """
    TB = x_ref.shape[0]
    H = whh_ref.shape[0]
    Bp = out_ref.shape[0]
    T1 = TB // Bp                       # number of retained timesteps (T-1)
    stride = out_ref.shape[1] // T1     # 128-aligned lane stride per step

    # Hoisted input projection: one MXU matmul for all retained timesteps,
    # with the r/z hidden biases already folded into bih.
    gi_all = (
        jnp.dot(x_ref[...], wih_ref[...], preferred_element_type=jnp.float32)
        + bih_ref[...]
    )  # ((T-1)*Bp, 3H)

    whh = whh_ref[...]
    # Broadcast the n-gate hidden bias once (hoisted out of the unrolled loop).
    bhn = jnp.broadcast_to(bhn_ref[...], (Bp, H))

    h = jnp.zeros((Bp, H), jnp.float32)
    # Fully unrolled serial recurrence with static indices (T is small/static);
    # each per-step gi slice is exactly one 8-row sublane tile.
    # TODO(synk): switch to lax.fori_loop / a time grid axis if T grows large
    # (full unroll at large T would inflate code size and spill vregs).
    for t in range(T1):
        gi = gi_all[t * Bp:(t + 1) * Bp, :]                          # (Bp, 3H)
        gh = jnp.dot(h, whh, preferred_element_type=jnp.float32)     # (Bp, 3H)

        r = jax.nn.sigmoid(gi[:, 0:H] + gh[:, 0:H])
        z = jax.nn.sigmoid(gi[:, H:2 * H] + gh[:, H:2 * H])
        # PyTorch GRU: b_hn stays inside the r-gate product.
        n = jnp.tanh(gi[:, 2 * H:3 * H] + r * (gh[:, 2 * H:3 * H] + bhn))
        h = (1.0 - z) * n + z * h

        # 128-aligned lane placement: no concat / lane-rotate chain in epilogue.
        out_ref[:, t * stride:t * stride + H] = h.astype(out_ref.dtype)


def prepare_gru_params(w_ih, w_hh, b_ih, b_hh):
    """One-time fusion of torch-style GRU parameters (gate order [r, z, n]).

    w_ih: (3, Din, H), w_hh: (3, H, H), b_ih/b_hh: (3, 1, H)
    (matching torch.nn.GRU's weight_ih_l0 / weight_hh_l0 row blocks, transposed).
    """
    wih_f = jnp.concatenate([w_ih[0], w_ih[1], w_ih[2]], axis=-1)        # (Din, 3H)
    whh_f = jnp.concatenate([w_hh[0], w_hh[1], w_hh[2]], axis=-1)        # (H, 3H)
    # b_hr / b_hz are purely additive into the sigmoid args -> fold into bih.
    bih_f = jnp.concatenate(
        [b_ih[0] + b_hh[0], b_ih[1] + b_hh[1], b_ih[2]], axis=-1)        # (1, 3H)
    bhn = b_hh[2]                                                        # (1, H)
    return wih_f, whh_f, bih_f, bhn


@jax.jit
def encoder_forward(x_btd, wih_f, whh_f, bih_f, bhn):
    """x_btd: (B, T, Din) float32 -> context (B, T-1, H), matching Encoder.forward."""
    B, T, Din = x_btd.shape
    H = whh_f.shape[0]
    Bp = ((B + SUBLANES - 1) // SUBLANES) * SUBLANES      # batch padded to sublane tile
    stride = ((H + LANES - 1) // LANES) * LANES           # 128-aligned per-step lanes

    # Time-major rows, discarded last timestep dropped, batch zero-padded.
    x_tm = jnp.transpose(x_btd, (1, 0, 2))[: T - 1]       # (T-1, B, Din)
    x_tm = jnp.pad(x_tm, ((0, 0), (0, Bp - B), (0, 0)))   # (T-1, Bp, Din)
    x_flat = x_tm.reshape((T - 1) * Bp, Din)

    vmem = pl.BlockSpec(memory_space=pltpu.MemorySpace.VMEM)
    out_flat = pl.pallas_call(
        gru_kernel,
        out_shape=jax.ShapeDtypeStruct((Bp, (T - 1) * stride), jnp.float32),
        in_specs=[vmem, vmem, vmem, vmem, vmem],
        out_specs=vmem,
    )(x_flat, wih_f, whh_f, bih_f, bhn)

    # Un-pad: drop padded batch rows and the per-step lane padding.
    return out_flat[:B].reshape(B, T - 1, stride)[:, :, :H]


def gru_reference(x_btd, w_ih, w_hh, b_ih, b_hh):
    """Pure-JAX reference matching torch.nn.GRU(batch_first=True) semantics."""
    B, T, Din = x_btd.shape
    H = w_ih.shape[-1]
    h = jnp.zeros((B, H), jnp.float32)
    outs = []
    for t in range(T):
        xt = x_btd[:, t, :]
        r = jax.nn.sigmoid(xt @ w_ih[0] + b_ih[0] + h @ w_hh[0] + b_hh[0])
        z = jax.nn.sigmoid(xt @ w_ih[1] + b_ih[1] + h @ w_hh[1] + b_hh[1])
        n = jnp.tanh(xt @ w_ih[2] + b_ih[2] + r * (h @ w_hh[2] + b_hh[2]))
        h = (1.0 - z) * n + z * h
        outs.append(h)
    return jnp.stack(outs, axis=1)[:, :-1, :]


if __name__ == "__main__":
    # Shapes consistent with the module: args.mdim=7 (-> input_size=8), args.hdim=32
    B, T, mdim, H = 2, 8, 7, 32
    Din = mdim + 1

    key = jax.random.PRNGKey(0)
    k_wih, k_whh, k_bih, k_bhh, k_x = jax.random.split(key, 5)

    # torch.nn.GRU default init: U(-1/sqrt(hdim), 1/sqrt(hdim)) for all params
    stdv = 1.0 / float(np.sqrt(H))
    w_ih = jax.random.uniform(k_wih, (3, Din, H), jnp.float32, -stdv, stdv)  # [r, z, n]
    w_hh = jax.random.uniform(k_whh, (3, H, H), jnp.float32, -stdv, stdv)
    b_ih = jax.random.uniform(k_bih, (3, 1, H), jnp.float32, -stdv, stdv)
    b_hh = jax.random.uniform(k_bhh, (3, 1, H), jnp.float32, -stdv, stdv)

    x = jax.random.normal(k_x, (B, T, Din), jnp.float32)

    # One-time parameter fusion (outside the per-call path).
    wih_f, whh_f, bih_f, bhn = prepare_gru_params(w_ih, w_hh, b_ih, b_hh)

    context = encoder_forward(x, wih_f, whh_f, bih_f, bhn)
    context = jax.block_until_ready(context)

    ref = gru_reference(x, w_ih, w_hh, b_ih, b_hh)
    assert context.shape == (B, T - 1, H), context.shape
    np.testing.assert_allclose(np.asarray(context), np.asarray(ref), rtol=1e-5, atol=1e-5)

    print("KERNEL_OK")
</pallas_src>

<mosaic_0001>
module attributes {stable_mosaic.version = 11 : i64} {
  func.func @gru_kernel(%arg0: memref<56x8xf32, #tpu.memory_space<vmem>>, %arg1: memref<8x96xf32, #tpu.memory_space<vmem>>, %arg2: memref<32x96xf32, #tpu.memory_space<vmem>>, %arg3: memref<1x96xf32, #tpu.memory_space<vmem>>, %arg4: memref<1x32xf32, #tpu.memory_space<vmem>>, %arg5: memref<8x896xf32, #tpu.memory_space<vmem>>) attributes {dimension_semantics = [], scalar_prefetch = 0 : i64, scratch_operands = 0 : i64, tpu.core_type = #tpu.core_type<tc>} {
    %c0 = arith.constant 0 : index
    %c0_0 = arith.constant 0 : index
    %0 = vector.load %arg0[%c0, %c0_0] : memref<56x8xf32, #tpu.memory_space<vmem>>, vector<56x8xf32>
    %c0_1 = arith.constant 0 : index
    %c0_2 = arith.constant 0 : index
    %1 = vector.load %arg1[%c0_1, %c0_2] : memref<8x96xf32, #tpu.memory_space<vmem>>, vector<8x96xf32>
    %cst = arith.constant dense<0.000000e+00> : vector<56x96xf32>
    %2 = tpu.matmul %0, %1, %cst {dimension_numbers = #tpu.dot_dimension_numbers<[1], [0], [0], [1], [0, 0, 1, 1], [], []>} : vector<56x8xf32>, vector<8x96xf32>, vector<56x96xf32> -> vector<56x96xf32>
    %c0_3 = arith.constant 0 : index
    %c0_4 = arith.constant 0 : index
    %3 = vector.load %arg3[%c0_3, %c0_4] : memref<1x96xf32, #tpu.memory_space<vmem>>, vector<1x96xf32>
    %4 = vector.broadcast %3 : vector<1x96xf32> to vector<56x96xf32>
    %5 = arith.addf %2, %4 : vector<56x96xf32>
    %c0_5 = arith.constant 0 : index
    %c0_6 = arith.constant 0 : index
    %6 = vector.load %arg2[%c0_5, %c0_6] : memref<32x96xf32, #tpu.memory_space<vmem>>, vector<32x96xf32>
    %c0_7 = arith.constant 0 : index
    %c0_8 = arith.constant 0 : index
    %7 = vector.load %arg4[%c0_7, %c0_8] : memref<1x32xf32, #tpu.memory_space<vmem>>, vector<1x32xf32>
    %8 = vector.shape_cast %7 : vector<1x32xf32> to vector<1x32xf32>
    %9 = vector.broadcast %8 : vector<1x32xf32> to vector<8x32xf32>
    %cst_9 = arith.constant 0.000000e+00 : f32
    %10 = vector.broadcast %cst_9 : f32 to vector<8x32xf32>
    %11 = vector.extract_strided_slice %5 {offsets = [0, 0], sizes = [8, 96], strides = [1, 1]} : vector<56x96xf32> to vector<8x96xf32>
    %cst_10 = arith.constant dense<0.000000e+00> : vector<8x96xf32>
    %12 = tpu.matmul %10, %6, %cst_10 {dimension_numbers = #tpu.dot_dimension_numbers<[1], [0], [0], [1], [0, 0, 1, 1], [], []>} : vector<8x32xf32>, vector<32x96xf32>, vector<8x96xf32> -> vector<8x96xf32>
    %13 = vector.extract_strided_slice %11 {offsets = [0, 0], sizes = [8, 32], strides = [1, 1]} : vector<8x96xf32> to vector<8x32xf32>
    %14 = vector.extract_strided_slice %12 {offsets = [0, 0], sizes = [8, 32], strides = [1, 1]} : vector<8x96xf32> to vector<8x32xf32>
    %15 = arith.addf %13, %14 : vector<8x32xf32>
    %16 = arith.negf %15 : vector<8x32xf32>
    %17 = math.exp %16 : vector<8x32xf32>
    %cst_11 = arith.constant 1.000000e+00 : f32
    %18 = vector.broadcast %cst_11 : f32 to vector<8x32xf32>
    %19 = arith.addf %18, %17 : vector<8x32xf32>
    %20 = arith.divf %18, %19 : vector<8x32xf32>
    %21 = vector.extract_strided_slice %11 {offsets = [0, 32], sizes = [8, 32], strides = [1, 1]} : vector<8x96xf32> to vector<8x32xf32>
    %22 = vector.extract_strided_slice %12 {offsets = [0, 32], sizes = [8, 32], strides = [1, 1]} : vector<8x96xf32> to vector<8x32xf32>
    %23 = arith.addf %21, %22 : vector<8x32xf32>
    %24 = arith.negf %23 : vector<8x32xf32>
    %25 = math.exp %24 : vector<8x32xf32>
    %cst_12 = arith.constant 1.000000e+00 : f32
    %26 = vector.broadcast %cst_12 : f32 to vector<8x32xf32>
    %27 = arith.addf %26, %25 : vector<8x32xf32>
    %28 = arith.divf %26, %27 : vector<8x32xf32>
    %29 = vector.extract_strided_slice %11 {offsets = [0, 64], sizes = [8, 32], strides = [1, 1]} : vector<8x96xf32> to vector<8x32xf32>
    %30 = vector.extract_strided_slice %12 {offsets = [0, 64], sizes = [8, 32], strides = [1, 1]} : vector<8x96xf32> to vector<8x32xf32>
    %31 = arith.addf %30, %9 : vector<8x32xf32>
    %32 = arith.mulf %20, %31 : vector<8x32xf32>
    %33 = arith.addf %29, %32 : vector<8x32xf32>
    %34 = math.tanh %33 : vector<8x32xf32>
    %cst_13 = arith.constant 1.000000e+00 : f32
    %35 = vector.broadcast %cst_13 : f32 to vector<8x32xf32>
    %36 = arith.subf %35, %28 : vector<8x32xf32>
    %37 = arith.mulf %36, %34 : vector<8x32xf32>
    %38 = arith.mulf %28, %10 : vector<8x32xf32>
    %39 = arith.addf %37, %38 : vector<8x32xf32>
    %c0_14 = arith.constant 0 : index
    %c0_15 = arith.constant 0 : index
    %40 = vector.load %arg5[%c0_14, %c0_15] : memref<8x896xf32, #tpu.memory_space<vmem>>, vector<8x32xf32>
    tpu.vector_store %arg5[%c0_14, %c0_15], %39 {strides = array<i32>} : memref<8x896xf32, #tpu.memory_space<vmem>>, vector<8x32xf32>,
    %41 = vector.extract_strided_slice %5 {offsets = [8, 0], sizes = [8, 96], strides = [1, 1]} : vector<56x96xf32> to vector<8x96xf32>
    %cst_16 = arith.constant dense<0.000000e+00> : vector<8x96xf32>
    %42 = tpu.matmul %39, %6, %cst_16 {dimension_numbers = #tpu.dot_dimension_numbers<[1], [0], [0], [1], [0, 0, 1, 1], [], []>} : vector<8x32xf32>, vector<32x96xf32>, vector<8x96xf32> -> vector<8x96xf32>
    %43 = vector.extract_strided_slice %41 {offsets = [0, 0], sizes = [8, 32], strides = [1, 1]} : vector<8x96xf32> to vector<8x32xf32>
    %44 = vector.extract_strided_slice %42 {offsets = [0, 0], sizes = [8, 32], strides = [1, 1]} : vector<8x96xf32> to vector<8x32xf32>
    %45 = arith.addf %43, %44 : vector<8x32xf32>
    %46 = arith.negf %45 : vector<8x32xf32>
    %47 = math.exp %46 : vector<8x32xf32>
    %cst_17 = arith.constant 1.000000e+00 : f32
    %48 = vector.broadcast %cst_17 : f32 to vector<8x32xf32>
    %49 = arith.addf %48, %47 : vector<8x32xf32>
    %50 = arith.divf %48, %49 : vector<8x32xf32>
    %51 = vector.extract_strided_slice %41 {offsets = [0, 32], sizes = [8, 32], strides = [1, 1]} : vector<8x96xf32> to vector<8x32xf32>
    %52 = vector.extract_strided_slice %42 {offsets = [0, 32], sizes = [8, 32], strides = [1, 1]} : vector<8x96xf32> to vector<8x32xf32>
    %53 = arith.addf %51, %52 : vector<8x32xf32>
    %54 = arith.negf %53 : vector<8x32xf32>
    %55 = math.exp %54 : vector<8x32xf32>
    %cst_18 = arith.constant 1.000000e+00 : f32
    %56 = vector.broadcast %cst_18 : f32 to vector<8x32xf32>
    %57 = arith.addf %56, %55 : vector<8x32xf32>
    %58 = arith.divf %56, %57 : vector<8x32xf32>
    %59 = vector.extract_strided_slice %41 {offsets = [0, 64], sizes = [8, 32], strides = [1, 1]} : vector<8x96xf32> to vector<8x32xf32>
    %60 = vector.extract_strided_slice %42 {offsets = [0, 64], sizes = [8, 32], strides = [1, 1]} : vector<8x96xf32> to vector<8x32xf32>
    %61 = arith.addf %60, %9 : vector<8x32xf32>
    %62 = arith.mulf %50, %61 : vector<8x32xf32>
    %63 = arith.addf %59, %62 : vector<8x32xf32>
    %64 = math.tanh %63 : vector<8x32xf32>
    %cst_19 = arith.constant 1.000000e+00 : f32
    %65 = vector.broadcast %cst_19 : f32 to vector<8x32xf32>
    %66 = arith.subf %65, %58 : vector<8x32xf32>
    %67 = arith.mulf %66, %64 : vector<8x32xf32>
    %68 = arith.mulf %58, %39 : vector<8x32xf32>
    %69 = arith.addf %67, %68 : vector<8x32xf32>
    %c0_20 = arith.constant 0 : index
    %c128 = arith.constant 128 : index
    %70 = vector.load %arg5[%c0_20, %c128] : memref<8x896xf32, #tpu.memory_space<vmem>>, vector<8x32xf32>
    tpu.vector_store %arg5[%c0_20, %c128], %69 {strides = array<i32>} : memref<8x896xf32, #tpu.memory_space<vmem>>, vector<8x32xf32>,
    %71 = vector.extract_strided_slice %5 {offsets = [16, 0], sizes = [8, 96], strides = [1, 1]} : vector<56x96xf32> to vector<8x96xf32>
    %cst_21 = arith.constant dense<0.000000e+00> : vector<8x96xf32>
    %72 = tpu.matmul %69, %6, %cst_21 {dimension_numbers = #tpu.dot_dimension_numbers<[1], [0], [0], [1], [0, 0, 1, 1], [], []>} : vector<8x32xf32>, vector<32x96xf32>, vector<8x96xf32> -> vector<8x96xf32>
    %73 = vector.extract_strided_slice %71 {offsets = [0, 0], sizes = [8, 32], strides = [1, 1]} : vector<8x96xf32> to vector<8x32xf32>
    %74 = vector.extract_strided_slice %72 {offsets = [0, 0], sizes = [8, 32], strides = [1, 1]} : vector<8x96xf32> to vector<8x32xf32>
    %75 = arith.addf %73, %74 : vector<8x32xf32>
    %76 = arith.negf %75 : vector<8x32xf32>
    %77 = math.exp %76 : vector<8x32xf32>
    %cst_22 = arith.constant 1.000000e+00 : f32
    %78 = vector.broadcast %cst_22 : f32 to vector<8x32xf32>
    %79 = arith.addf %78, %77 : vector<8x32xf32>
    %80 = arith.divf %78, %79 : vector<8x32xf32>
    %81 = vector.extract_strided_slice %71 {offsets = [0, 32], sizes = [8, 32], strides = [1, 1]} : vector<8x96xf32> to vector<8x32xf32>
    %82 = vector.extract_strided_slice %72 {offsets = [0, 32], sizes = [8, 32], strides = [1, 1]} : vector<8x96xf32> to vector<8x32xf32>
    %83 = arith.addf %81, %82 : vector<8x32xf32>
    %84 = arith.negf %83 : vector<8x32xf32>
    %85 = math.exp %84 : vector<8x32xf32>
    %cst_23 = arith.constant 1.000000e+00 : f32
    %86 = vector.broadcast %cst_23 : f32 to vector<8x32xf32>
    %87 = arith.addf %86, %85 : vector<8x32xf32>
    %88 = arith.divf %86, %87 : vector<8x32xf32>
    %89 = vector.extract_strided_slice %71 {offsets = [0, 64], sizes = [8, 32], strides = [1, 1]} : vector<8x96xf32> to vector<8x32xf32>
    %90 = vector.extract_strided_slice %72 {offsets = [0, 64], sizes = [8, 32], strides = [1, 1]} : vector<8x96xf32> to vector<8x32xf32>
    %91 = arith.addf %90, %9 : vector<8x32xf32>
    %92 = arith.mulf %80, %91 : vector<8x32xf32>
    %93 = arith.addf %89, %92 : vector<8x32xf32>
    %94 = math.tanh %93 : vector<8x32xf32>
    %cst_24 = arith.constant 1.000000e+00 : f32
    %95 = vector.broadcast %cst_24 : f32 to vector<8x32xf32>
    %96 = arith.subf %95, %88 : vector<8x32xf32>
    %97 = arith.mulf %96, %94 : vector<8x32xf32>
    %98 = arith.mulf %88, %69 : vector<8x32xf32>
    %99 = arith.addf %97, %98 : vector<8x32xf32>
    %c0_25 = arith.constant 0 : index
    %c256 = arith.constant 256 : index
    %100 = vector.load %arg5[%c0_25, %c256] : memref<8x896xf32, #tpu.memory_space<vmem>>, vector<8x32xf32>
    tpu.vector_store %arg5[%c0_25, %c256], %99 {strides = array<i32>} : memref<8x896xf32, #tpu.memory_space<vmem>>, vector<8x32xf32>,
    %101 = vector.extract_strided_slice %5 {offsets = [24, 0], sizes = [8, 96], strides = [1, 1]} : vector<56x96xf32> to vector<8x96xf32>
    %cst_26 = arith.constant dense<0.000000e+00> : vector<8x96xf32>
    %102 = tpu.matmul %99, %6, %cst_26 {dimension_numbers = #tpu.dot_dimension_numbers<[1], [0], [0], [1], [0, 0, 1, 1], [], []>} : vector<8x32xf32>, vector<32x96xf32>, vector<8x96xf32> -> vector<8x96xf32>
    %103 = vector.extract_strided_slice %101 {offsets = [0, 0], sizes = [8, 32], strides = [1, 1]} : vector<8x96xf32> to vector<8x32xf32>
    %104 = vector.extract_strided_slice %102 {offsets = [0, 0], sizes = [8, 32], strides = [1, 1]} : vector<8x96xf32> to vector<8x32xf32>
    %105 = arith.addf %103, %104 : vector<8x32xf32>
    %106 = arith.negf %105 : vector<8x32xf32>
    %107 = math.exp %106 : vector<8x32xf32>
    %cst_27 = arith.constant 1.000000e+00 : f32
    %108 = vector.broadcast %cst_27 : f32 to vector<8x32xf32>
    %109 = arith.addf %108, %107 : vector<8x32xf32>
    %110 = arith.divf %108, %109 : vector<8x32xf32>
    %111 = vector.extract_strided_slice %101 {offsets = [0, 32], sizes = [8, 32], strides = [1, 1]} : vector<8x96xf32> to vector<8x32xf32>
    %112 = vector.extract_strided_slice %102 {offsets = [0, 32], sizes = [8, 32], strides = [1, 1]} : vector<8x96xf32> to vector<8x32xf32>
    %113 = arith.addf %111, %112 : vector<8x32xf32>
    %114 = arith.negf %113 : vector<8x32xf32>
    %115 = math.exp %114 : vector<8x32xf32>
    %cst_28 = arith.constant 1.000000e+00 : f32
    %116 = vector.broadcast %cst_28 : f32 to vector<8x32xf32>
    %117 = arith.addf %116, %115 : vector<8x32xf32>
    %118 = arith.divf %116, %117 : vector<8x32xf32>
    %119 = vector.extract_strided_slice %101 {offsets = [0, 64], sizes = [8, 32], strides = [1, 1]} : vector<8x96xf32> to vector<8x32xf32>
    %120 = vector.extract_strided_slice %102 {offsets = [0, 64], sizes = [8, 32], strides = [1, 1]} : vector<8x96xf32> to vector<8x32xf32>
    %121 = arith.addf %120, %9 : vector<8x32xf32>
    %122 = arith.mulf %110, %121 : vector<8x32xf32>
    %123 = arith.addf %119, %122 : vector<8x32xf32>
    %124 = math.tanh %123 : vector<8x32xf32>
    %cst_29 = arith.constant 1.000000e+00 : f32
    %125 = vector.broadcast %cst_29 : f32 to vector<8x32xf32>
    %126 = arith.subf %125, %118 : vector<8x32xf32>
    %127 = arith.mulf %126, %124 : vector<8x32xf32>
    %128 = arith.mulf %118, %99 : vector<8x32xf32>
    %129 = arith.addf %127, %128 : vector<8x32xf32>
    %c0_30 = arith.constant 0 : index
    %c384 = arith.constant 384 : index
    %130 = vector.load %arg5[%c0_30, %c384] : memref<8x896xf32, #tpu.memory_space<vmem>>, vector<8x32xf32>
    tpu.vector_store %arg5[%c0_30, %c384], %129 {strides = array<i32>} : memref<8x896xf32, #tpu.memory_space<vmem>>, vector<8x32xf32>,
    %131 = vector.extract_strided_slice %5 {offsets = [32, 0], sizes = [8, 96], strides = [1, 1]} : vector<56x96xf32> to vector<8x96xf32>
    %cst_31 = arith.constant dense<0.000000e+00> : vector<8x96xf32>
    %132 = tpu.matmul %129, %6, %cst_31 {dimension_numbers = #tpu.dot_dimension_numbers<[1], [0], [0], [1], [0, 0, 1, 1], [], []>} : vector<8x32xf32>, vector<32x96xf32>, vector<8x96xf32> -> vector<8x96xf32>
    %133 = vector.extract_strided_slice %131 {offsets = [0, 0], sizes = [8, 32], strides = [1, 1]} : vector<8x96xf32> to vector<8x32xf32>
    %134 = vector.extract_strided_slice %132 {offsets = [0, 0], sizes = [8, 32], strides = [1, 1]} : vector<8x96xf32> to vector<8x32xf32>
    %135 = arith.addf %133, %134 : vector<8x32xf32>
    %136 = arith.negf %135 : vector<8x32xf32>
    %137 = math.exp %136 : vector<8x32xf32>
    %cst_32 = arith.constant 1.000000e+00 : f32
    %138 = vector.broadcast %cst_32 : f32 to vector<8x32xf32>
    %139 = arith.addf %138, %137 : vector<8x32xf32>
    %140 = arith.divf %138, %139 : vector<8x32xf32>
    %141 = vector.extract_strided_slice %131 {offsets = [0, 32], sizes = [8, 32], strides = [1, 1]} : vector<8x96xf32> to vector<8x32xf32>
    %142 = vector.extract_strided_slice %132 {offsets = [0, 32], sizes = [8, 32], strides = [1, 1]} : vector<8x96xf32> to vector<8x32xf32>
    %143 = arith.addf %141, %142 : vector<8x32xf32>
    %144 = arith.negf %143 : vector<8x32xf32>
    %145 = math.exp %144 : vector<8x32xf32>
    %cst_33 = arith.constant 1.000000e+00 : f32
    %146 = vector.broadcast %cst_33 : f32 to vector<8x32xf32>
    %147 = arith.addf %146, %145 : vector<8x32xf32>
    %148 = arith.divf %146, %147 : vector<8x32xf32>
    %149 = vector.extract_strided_slice %131 {offsets = [0, 64], sizes = [8, 32], strides = [1, 1]} : vector<8x96xf32> to vector<8x32xf32>
    %150 = vector.extract_strided_slice %132 {offsets = [0, 64], sizes = [8, 32], strides = [1, 1]} : vector<8x96xf32> to vector<8x32xf32>
    %151 = arith.addf %150, %9 : vector<8x32xf32>
    %152 = arith.mulf %140, %151 : vector<8x32xf32>
    %153 = arith.addf %149, %152 : vector<8x32xf32>
    %154 = math.tanh %153 : vector<8x32xf32>
    %cst_34 = arith.constant 1.000000e+00 : f32
    %155 = vector.broadcast %cst_34 : f32 to vector<8x32xf32>
    %156 = arith.subf %155, %148 : vector<8x32xf32>
    %157 = arith.mulf %156, %154 : vector<8x32xf32>
    %158 = arith.mulf %148, %129 : vector<8x32xf32>
    %159 = arith.addf %157, %158 : vector<8x32xf32>
    %c0_35 = arith.constant 0 : index
    %c512 = arith.constant 512 : index
    %160 = vector.load %arg5[%c0_35, %c512] : memref<8x896xf32, #tpu.memory_space<vmem>>, vector<8x32xf32>
    tpu.vector_store %arg5[%c0_35, %c512], %159 {strides = array<i32>} : memref<8x896xf32, #tpu.memory_space<vmem>>, vector<8x32xf32>,
    %161 = vector.extract_strided_slice %5 {offsets = [40, 0], sizes = [8, 96], strides = [1, 1]} : vector<56x96xf32> to vector<8x96xf32>
    %cst_36 = arith.constant dense<0.000000e+00> : vector<8x96xf32>
    %162 = tpu.matmul %159, %6, %cst_36 {dimension_numbers = #tpu.dot_dimension_numbers<[1], [0], [0], [1], [0, 0, 1, 1], [], []>} : vector<8x32xf32>, vector<32x96xf32>, vector<8x96xf32> -> vector<8x96xf32>
    %163 = vector.extract_strided_slice %161 {offsets = [0, 0], sizes = [8, 32], strides = [1, 1]} : vector<8x96xf32> to vector<8x32xf32>
    %164 = vector.extract_strided_slice %162 {offsets = [0, 0], sizes = [8, 32], strides = [1, 1]} : vector<8x96xf32> to vector<8x32xf32>
    %165 = arith.addf %163, %164 : vector<8x32xf32>
    %166 = arith.negf %165 : vector<8x32xf32>
    %167 = math.exp %166 : vector<8x32xf32>
    %cst_37 = arith.constant 1.000000e+00 : f32
    %168 = vector.broadcast %cst_37 : f32 to vector<8x32xf32>
    %169 = arith.addf %168, %167 : vector<8x32xf32>
    %170 = arith.divf %168, %169 : vector<8x32xf32>
    %171 = vector.extract_strided_slice %161 {offsets = [0, 32], sizes = [8, 32], strides = [1, 1]} : vector<8x96xf32> to vector<8x32xf32>
    %172 = vector.extract_strided_slice %162 {offsets = [0, 32], sizes = [8, 32], strides = [1, 1]} : vector<8x96xf32> to vector<8x32xf32>
    %173 = arith.addf %171, %172 : vector<8x32xf32>
    %174 = arith.negf %173 : vector<8x32xf32>
    %175 = math.exp %174 : vector<8x32xf32>
    %cst_38 = arith.constant 1.000000e+00 : f32
    %176 = vector.broadcast %cst_38 : f32 to vector<8x32xf32>
    %177 = arith.addf %176, %175 : vector<8x32xf32>
    %178 = arith.divf %176, %177 : vector<8x32xf32>
    %179 = vector.extract_strided_slice %161 {offsets = [0, 64], sizes = [8, 32], strides = [1, 1]} : vector<8x96xf32> to vector<8x32xf32>
    %180 = vector.extract_strided_slice %162 {offsets = [0, 64], sizes = [8, 32], strides = [1, 1]} : vector<8x96xf32> to vector<8x32xf32>
    %181 = arith.addf %180, %9 : vector<8x32xf32>
    %182 = arith.mulf %170, %181 : vector<8x32xf32>
    %183 = arith.addf %179, %182 : vector<8x32xf32>
    %184 = math.tanh %183 : vector<8x32xf32>
    %cst_39 = arith.constant 1.000000e+00 : f32
    %185 = vector.broadcast %cst_39 : f32 to vector<8x32xf32>
    %186 = arith.subf %185, %178 : vector<8x32xf32>
    %187 = arith.mulf %186, %184 : vector<8x32xf32>
    %188 = arith.mulf %178, %159 : vector<8x32xf32>
    %189 = arith.addf %187, %188 : vector<8x32xf32>
    %c0_40 = arith.constant 0 : index
    %c640 = arith.constant 640 : index
    %190 = vector.load %arg5[%c0_40, %c640] : memref<8x896xf32, #tpu.memory_space<vmem>>, vector<8x32xf32>
    tpu.vector_store %arg5[%c0_40, %c640], %189 {strides = array<i32>} : memref<8x896xf32, #tpu.memory_space<vmem>>, vector<8x32xf32>,
    %191 = vector.extract_strided_slice %5 {offsets = [48, 0], sizes = [8, 96], strides = [1, 1]} : vector<56x96xf32> to vector<8x96xf32>
    %cst_41 = arith.constant dense<0.000000e+00> : vector<8x96xf32>
    %192 = tpu.matmul %189, %6, %cst_41 {dimension_numbers = #tpu.dot_dimension_numbers<[1], [0], [0], [1], [0, 0, 1, 1], [], []>} : vector<8x32xf32>, vector<32x96xf32>, vector<8x96xf32> -> vector<8x96xf32>
    %193 = vector.extract_strided_slice %191 {offsets = [0, 0], sizes = [8, 32], strides = [1, 1]} : vector<8x96xf32> to vector<8x32xf32>
    %194 = vector.extract_strided_slice %192 {offsets = [0, 0], sizes = [8, 32], strides = [1, 1]} : vector<8x96xf32> to vector<8x32xf32>
    %195 = arith.addf %193, %194 : vector<8x32xf32>
    %196 = arith.negf %195 : vector<8x32xf32>
    %197 = math.exp %196 : vector<8x32xf32>
    %cst_42 = arith.constant 1.000000e+00 : f32
    %198 = vector.broadcast %cst_42 : f32 to vector<8x32xf32>
    %199 = arith.addf %198, %197 : vector<8x32xf32>
    %200 = arith.divf %198, %199 : vector<8x32xf32>
    %201 = vector.extract_strided_slice %191 {offsets = [0, 32], sizes = [8, 32], strides = [1, 1]} : vector<8x96xf32> to vector<8x32xf32>
    %202 = vector.extract_strided_slice %192 {offsets = [0, 32], sizes = [8, 32], strides = [1, 1]} : vector<8x96xf32> to vector<8x32xf32>
    %203 = arith.addf %201, %202 : vector<8x32xf32>
    %204 = arith.negf %203 : vector<8x32xf32>
    %205 = math.exp %204 : vector<8x32xf32>
    %cst_43 = arith.constant 1.000000e+00 : f32
    %206 = vector.broadcast %cst_43 : f32 to vector<8x32xf32>
    %207 = arith.addf %206, %205 : vector<8x32xf32>
    %208 = arith.divf %206, %207 : vector<8x32xf32>
    %209 = vector.extract_strided_slice %191 {offsets = [0, 64], sizes = [8, 32], strides = [1, 1]} : vector<8x96xf32> to vector<8x32xf32>
    %210 = vector.extract_strided_slice %192 {offsets = [0, 64], sizes = [8, 32], strides = [1, 1]} : vector<8x96xf32> to vector<8x32xf32>
    %211 = arith.addf %210, %9 : vector<8x32xf32>
    %212 = arith.mulf %200, %211 : vector<8x32xf32>
    %213 = arith.addf %209, %212 : vector<8x32xf32>
    %214 = math.tanh %213 : vector<8x32xf32>
    %cst_44 = arith.constant 1.000000e+00 : f32
    %215 = vector.broadcast %cst_44 : f32 to vector<8x32xf32>
    %216 = arith.subf %215, %208 : vector<8x32xf32>
    %217 = arith.mulf %216, %214 : vector<8x32xf32>
    %218 = arith.mulf %208, %189 : vector<8x32xf32>
    %219 = arith.addf %217, %218 : vector<8x32xf32>
    %c0_45 = arith.constant 0 : index
    %c768 = arith.constant 768 : index
    %220 = vector.load %arg5[%c0_45, %c768] : memref<8x896xf32, #tpu.memory_space<vmem>>, vector<8x32xf32>
    tpu.vector_store %arg5[%c0_45, %c768], %219 {strides = array<i32>} : memref<8x896xf32, #tpu.memory_space<vmem>>, vector<8x32xf32>,
    return
  }
}

</mosaic_0001>

<bundles_post_ra>
// kernel: encoder_forward.1
= control target key start
LH: loop header
LB: loop body
LE: loop exit
PB: predicated region body
PF: predicated region fallthrough
CT: control target
= control target key end

     0   :  { %v1115_v0 = vmov 0.0   ;;  %vm35_vm0 = vcmask 64512   ;;  %vm1116_vm1 = vmmov 0   ;;  %s1117_s6 = smov 64   ;;  %vm167_vm2 = vcmask 261120   ;;  %s1379_s2 = inlined_call_operand.vmem [shape: f32[32,96], index: 2, kind: input, shape index: {}]   ;;  %s1380_s1 = inlined_call_operand.vmem [shape: f32[8,96], index: 1, kind: input, shape index: {}]   ;;  %s1381_s0 = inlined_call_operand.vmem [shape: f32[56,8], index: 0, kind: input, shape index: {}]   ;;  %s1382_s4 = inlined_call_operand.vmem [shape: f32[1,32], index: 4, kind: input, shape index: {}]   ;;  %s1383_s3 = inlined_call_operand.vmem [shape: f32[1,96], index: 3, kind: input, shape index: {}]   ;;  %s1384_s5 = inlined_call_operand.vmem [shape: f32[8,896], index: 5, kind: output, shape index: {}]  }
   0x1   :  { %992 = vmatprep.subr.mxu1 %v1115_v0  ;;  %v1153_v1 = vld [vmem:[%s1379_s2 + $0x18] sm:$0xff]  ;;  %v1158_v2 = vld [vmem:[%s1379_s2 + $0x10] sm:$0xff]  ;;  %969 = vmatprep.subr.mxu0 %v1115_v0  ;;  %v27_v3 = vld [vmem:[%s1380_s1] sm:$0xff] }
   0x2   :  { %993 = vmatpush3.msra.mxu1 %v1153_v1  ;;  %970 = vmatpush3.msra.mxu0 %v27_v3  ;;  %v20_v4 = vld [vmem:[%s1381_s0] sm:$0xff]  ;;  %v1174_v5 = vld [vmem:[%s1379_s2 + $0x8] sm:$0xff]  ;;  %v22_v48 = vld [vmem:[%s1381_s0 + $0x10] sm:$0xff] }
   0x3   :  { %994 = vmatprep.subr.mxu1 %v1115_v0  ;;  %971 = vmatprep.mubr.msk.f32.mxu0 %vm1116_vm1, %v1115_v0  ;;  %v912_v6 = vld [vmem:[%s1382_s4] ss:$0 sm:$0xff]  ;;  %v21_v25 = vld [vmem:[%s1381_s0 + $0x8] sm:$0xff] }
   0x4   :  { %995 = vmatpush3.msra.mxu1 %v1158_v2  ;;  %972 = vmatmul.mubr.msk.f32.vlgmr.msra.gmra.mxu0 %vm35_vm0, %v20_v4  ;;  %v1185_v7 = vld [vmem:[%s1379_s2] sm:$0xff] }
   0x5   :  { %996 = vmatprep.subr.mxu1 %v1115_v0  ;;  %1000 = vmatprep.mubr.msk.f32.mxu1 %vm1116_vm1, %v1115_v0  ;;  %v1223_v14 = vld [vmem:[%s1383_s3] ss:$0 sm:$0xff]  ;;  %s1118_s3 = smov 96  }
   0x6   :  { %997 = vmatpush3.msra.mxu1 %v1174_v5  ;;  %248 = vrot.lane.b32.xlu0 %v912_v6, %s1117_s6 }
   0x7   :  { %998 = vmatprep.subr.mxu1 %v1115_v0  ;;  %974 = vmatprep.mubr.msk.f32.mxu0 %vm1116_vm1, %v1115_v0 }
   0x8   :  { %999 = vmatpush3.msra.mxu1 %v1185_v7  ;;  %1025 = vmatprep.subr.mxu0 %v1115_v0 }
   0x9   :  { %1001 = vmatmul.mubr.f32.vlgmr.msra.gmra.mxu1 %v1115_v0  ;;  %1003 = vmatprep.subr.mxu1 %v1115_v0 }
   0xa   :  { %1004 = vmatpush3.msra.mxu1 %v1153_v1  ;;  %1011 = vmatprep.mubr.msk.f32.mxu1 %vm1116_vm1, %v1115_v0 }
   0xb   :  { %1005 = vmatprep.subr.mxu1 %v1115_v0  ;;  %1026 = vmatpush3.msra.mxu0 %v1153_v1 }
   0xc   :  { %1006 = vmatpush3.msra.mxu1 %v1158_v2  ;;  %1027 = vmatprep.subr.mxu0 %v1115_v0 }
   0xd   :  { %1007 = vmatprep.subr.mxu1 %v1115_v0  ;;  %1028 = vmatpush3.msra.mxu0 %v1158_v2 }
   0xe   :  { %1008 = vmatpush3.msra.mxu1 %v1174_v5  ;;  %1029 = vmatprep.subr.mxu0 %v1115_v0 }
   0xf   :  { %1009 = vmatprep.subr.mxu1 %v1115_v0  ;;  %1030 = vmatpush3.msra.mxu0 %v1174_v5 }
  0x10   :  { %1010 = vmatpush3.msra.mxu1 %v1185_v7  ;;  %1031 = vmatprep.subr.mxu0 %v1115_v0 }
  0x11   :  { %1014 = vmatprep.subr.mxu1 %v1115_v0  ;;  %1032 = vmatpush3.msra.mxu0 %v1185_v7 }
  0x12   :  { %1047 = vmatprep.subr.mxu0 %v1115_v0  ;;  %975 = vmatmul.mubr.msk.f32.gmra.mxu0 %vm35_vm0, %v21_v25 }
  0x13   :  { %977 = vmatprep.mubr.msk.f32.mxu0 %vm1116_vm1, %v1115_v0 }
  0x16   :  { %978 = vmatmul.mubr.msk.f32.gmra.mxu0 %vm35_vm0, %v22_v48 }
  0x17   :  { %980 = vmatprep.mubr.msk.f32.mxu0 %vm1116_vm1, %v1115_v0 }
  0x78   :  { %v1216_v10 = vpop.permute.xlu0 %248 }
  0xc4   :  { %v123_v8 = vpop.f32.mrf.mxu0 }
  0xc5   :  { %v124_v15 = vadd.f32 %v1223_v14, %v123_v8 }
  0xc6   :  { %v973_v9 = vpop.f32.mrf.mxu0 }
  0xc9   :  { %v237_v11 = vpop.f32.mrf.mxu1 }
  0xca   :  { %v251_v12 = vadd.f32 %v1216_v10, %v237_v11  ;;  %v241_v16 = vadd.f32 %v237_v11, %v124_v15 }
  0xcb   :  { %v1002_v13 = vpop.f32.mrf.mxu1 }
  0xcc   :  { %253 = vrot.lane.b32.xlu0 %v251_v12, %s1117_s6  ;;  %v913_v17 = vmul.f32 -1.442695, %v241_v16  ;;  %v23_v13 = vld [vmem:[%s1381_s0 + $0x18] sm:$0xff]  ;;  %v25_v16 = vld [vmem:[%s1381_s0 + $0x28] sm:$0xff] }
  0xcd   :  { %981 = vmatmul.mubr.msk.f32.gmra.mxu0 %vm35_vm0, %v23_v13 }
  0xce   :  { %1073 = vpow2.f32 %v913_v17  ;;  %983 = vmatprep.mubr.msk.f32.mxu0 %vm1116_vm1, %v1115_v0 }
  0xd2   :  { %v128_v32 = vpop.f32.mrf.mxu0 }
  0xd3   :  { %v129_v38 = vadd.f32 %v1223_v14, %v128_v32 }
  0xd4   :  { %v976_v33 = vpop.f32.mrf.mxu0 }
  0xd6   :  { %v133_v55 = vpop.f32.mrf.mxu0 }
  0xd7   :  { %v134_v61 = vadd.f32 %v1223_v14, %v133_v55 }
  0xd8   :  { %v979_v56 = vpop.f32.mrf.mxu0 }
  0xdb   :  { %v1074_v18 = vpop.eup %1073 }
  0xdc   :  { %v245_v19 = vadd.f32 1.0, %v1074_v18  ;;  %v26_v18 = vld [vmem:[%s1381_s0 + $0x30] sm:$0xff] }
  0xde   :  { %1075 = vrcp.f32 %v245_v19 }
  0xeb   :  { %v1076_v20 = vpop.eup %1075 }
  0xec   :  { %v263_v27 = vsub.f32 1.0, %v1076_v20  ;;  %v269_v29 = vmul.f32 0.0, %v1076_v20 }
 0x13e   :  { %v254_v21 = vpop.permute.xlu0 %253 }
 0x13f   :  { %v256_v22 = vmul.f32 %v1076_v20, %v254_v21 }
 0x141   :  { %258 = vrot.lane.b32.xlu1 %v256_v22, %s1117_s6 }
 0x1b3   :  { %v259_v23 = vpop.permute.xlu1 %258 }
 0x1b4   :  { %v261_v24 = vadd.f32 %v259_v23, %v124_v15  ;;  %v24_v15 = vld [vmem:[%s1381_s0 + $0x20] sm:$0xff] }
 0x1b5   :  { %984 = vmatmul.mubr.msk.f32.gmra.mxu0 %vm35_vm0, %v24_v15 }
 0x1b6   :  { %1077 = vtanh.f32 %v261_v24  ;;  %986 = vmatprep.mubr.msk.f32.mxu0 %vm1116_vm1, %v1115_v0  ;;  %v138_v24 = vpop.f32.mrf.mxu0 }
 0x1b8   :  { %v982_v25 = vpop.f32.mrf.mxu0 }
 0x1b9   :  { %987 = vmatmul.mubr.msk.f32.gmra.mxu0 %vm35_vm0, %v25_v16 }
 0x1ba   :  { %989 = vmatprep.mubr.msk.f32.mxu0 %vm1116_vm1, %v1115_v0 }
 0x1bd   :  { %990 = vmatmul.mubr.msk.f32.gmra.mxu0 %vm35_vm0, %v26_v18 }
 0x1be   :  { %1033 = vmatprep.mubr.msk.f32.mxu0 %vm1116_vm1, %v1115_v0 }
 0x1c3   :  { %v1078_v26 = vpop.eup %1077 }
 0x1c4   :  { %265 = vrot.lane.b32.xlu1 %v1078_v26, %s1118_s3 }
 0x236   :  { %v266_v28 = vpop.permute.xlu1 %265 }
 0x237   :  { %v268_v30 = vmul.f32 %v266_v28, %v263_v27 }
 0x239   :  { %v270_v31 = vadd.f32 %v269_v29, %v268_v30 }
 0x23b   :  { %272 = vrot.lane.b32.xlu0 %v270_v31, %s1118_s3 }
 0x275   :  { %v143_v26 = vpop.f32.mrf.mxu0 }
 0x277   :  { %v985_v27 = vpop.f32.mrf.mxu0 }
 0x279   :  { %v1307_v28 = vpop.f32.mrf.mxu0 }
 0x27a   :  { %v149_v13 = vadd.f32 %v1223_v14, %v1307_v28 }
 0x27b   :  { %v988_v29 = vpop.f32.mrf.mxu0 }
 0x27d   :  { %v1309_v30 = vpop.f32.mrf.mxu0 }
 0x2ad   :  { %v273_v34 = vpop.permute.xlu0 %272 }
 0x2ae   :  { %275 = vst.msk [vmem:[%s1384_s5] sm:$0xff] %vm167_vm2, %v273_v34  ;;  %1012 = vmatmul.mubr.msk.f32.vlgmr.msra.gmra.mxu1 %vm167_vm2, %v273_v34 }
 0x2af   :  { %1015 = vmatpush3.msra.mxu1 %v1153_v1  ;;  %1022 = vmatprep.mubr.msk.f32.mxu1 %vm1116_vm1, %v1115_v0 }
 0x2b0   :  { %1016 = vmatprep.subr.mxu1 %v1115_v0 }
 0x2b1   :  { %1017 = vmatpush3.msra.mxu1 %v1158_v2 }
 0x2b2   :  { %1018 = vmatprep.subr.mxu1 %v1115_v0 }
 0x2b3   :  { %1019 = vmatpush3.msra.mxu1 %v1174_v5 }
 0x2b4   :  { %1020 = vmatprep.subr.mxu1 %v1115_v0 }
 0x2b5   :  { %1021 = vmatpush3.msra.mxu1 %v1185_v7 }
 0x2b6   :  { %1036 = vmatprep.subr.mxu1 %v1115_v0 }
 0x36e   :  { %v344_v35 = vpop.f32.mrf.mxu1 }
 0x36f   :  { %v355_v36 = vadd.f32 %v344_v35, %v1216_v10  ;;  %v348_v39 = vadd.f32 %v344_v35, %v129_v38 }
 0x370   :  { %v1013_v37 = vpop.f32.mrf.mxu1 }
 0x371   :  { %357 = vrot.lane.b32.xlu1 %v355_v36, %s1117_s6  ;;  %v915_v40 = vmul.f32 -1.442695, %v348_v39  ;;  %v139_v36 = vadd.f32 %v1223_v14, %v138_v24 }
 0x373   :  { %1079 = vpow2.f32 %v915_v40 }
 0x380   :  { %v1080_v41 = vpop.eup %1079 }
 0x381   :  { %v352_v42 = vadd.f32 1.0, %v1080_v41 }
 0x383   :  { %1081 = vrcp.f32 %v352_v42 }
 0x390   :  { %v1082_v43 = vpop.eup %1081 }
 0x391   :  { %v367_v50 = vsub.f32 1.0, %v1082_v43  ;;  %v373_v52 = vmul.f32 %v1082_v43, %v270_v31  ;;  %v991_v31 = vpop.f32.mrf.mxu0 }
 0x3e3   :  { %v358_v44 = vpop.permute.xlu1 %357 }
 0x3e4   :  { %v360_v45 = vmul.f32 %v1082_v43, %v358_v44 }
 0x3e6   :  { %362 = vrot.lane.b32.xlu0 %v360_v45, %s1117_s6 }
 0x458   :  { %v363_v46 = vpop.permute.xlu0 %362 }
 0x459   :  { %v365_v47 = vadd.f32 %v363_v46, %v129_v38 }
 0x45b   :  { %1083 = vtanh.f32 %v365_v47 }
 0x468   :  { %v1084_v49 = vpop.eup %1083 }
 0x469   :  { %369 = vrot.lane.b32.xlu1 %v1084_v49, %s1118_s3 }
 0x4db   :  { %v370_v51 = vpop.permute.xlu1 %369 }
 0x4dc   :  { %v372_v53 = vmul.f32 %v370_v51, %v367_v50 }
 0x4de   :  { %v374_v54 = vadd.f32 %v373_v52, %v372_v53 }
 0x4e0   :  { %376 = vrot.lane.b32.xlu0 %v374_v54, %s1118_s3 }
 0x552   :  { %v377_v57 = vpop.permute.xlu0 %376 }
 0x553   :  { %379 = vst.msk [vmem:[%s1384_s5 + $0x8] sm:$0xff] %vm167_vm2, %v377_v57  ;;  %1023 = vmatmul.mubr.msk.f32.vlgmr.msra.gmra.mxu1 %vm167_vm2, %v377_v57 }
 0x554   :  { %1037 = vmatpush3.msra.mxu1 %v1153_v1  ;;  %1044 = vmatprep.mubr.msk.f32.mxu1 %vm1116_vm1, %v1115_v0 }
 0x555   :  { %1038 = vmatprep.subr.mxu1 %v1115_v0 }
 0x556   :  { %1039 = vmatpush3.msra.mxu1 %v1158_v2 }
 0x557   :  { %1040 = vmatprep.subr.mxu1 %v1115_v0 }
 0x558   :  { %1041 = vmatpush3.msra.mxu1 %v1174_v5 }
 0x559   :  { %1042 = vmatprep.subr.mxu1 %v1115_v0 }
 0x55a   :  { %1043 = vmatpush3.msra.mxu1 %v1185_v7 }
 0x55b   :  { %1058 = vmatprep.subr.mxu1 %v1115_v0 }
 0x613   :  { %v448_v58 = vpop.f32.mrf.mxu1 }
 0x614   :  { %v459_v59 = vadd.f32 %v448_v58, %v1216_v10  ;;  %v452_v62 = vadd.f32 %v448_v58, %v134_v61 }
 0x615   :  { %v1024_v60 = vpop.f32.mrf.mxu1 }
 0x616   :  { %461 = vrot.lane.b32.xlu1 %v459_v59, %s1117_s6  ;;  %v917_v63 = vmul.f32 -1.442695, %v452_v62 }
 0x618   :  { %1085 = vpow2.f32 %v917_v63 }
 0x625   :  { %v1086_v3 = vpop.eup %1085 }
 0x626   :  { %v456_v4 = vadd.f32 1.0, %v1086_v3 }
 0x628   :  { %1087 = vrcp.f32 %v456_v4 }
 0x635   :  { %v1088_v6 = vpop.eup %1087 }
 0x636   :  { %v471_v19 = vsub.f32 1.0, %v1088_v6  ;;  %v477_v21 = vmul.f32 %v1088_v6, %v374_v54 }
 0x688   :  { %v462_v8 = vpop.permute.xlu1 %461 }
 0x689   :  { %v464_v9 = vmul.f32 %v1088_v6, %v462_v8 }
 0x68b   :  { %466 = vrot.lane.b32.xlu0 %v464_v9, %s1117_s6 }
 0x6fd   :  { %v467_v11 = vpop.permute.xlu0 %466 }
 0x6fe   :  { %v469_v12 = vadd.f32 %v467_v11, %v134_v61 }
 0x700   :  { %1089 = vtanh.f32 %v469_v12 }
 0x70d   :  { %v1090_v17 = vpop.eup %1089 }
 0x70e   :  { %473 = vrot.lane.b32.xlu1 %v1090_v17, %s1118_s3 }
 0x780   :  { %v474_v20 = vpop.permute.xlu1 %473 }
 0x781   :  { %v476_v22 = vmul.f32 %v474_v20, %v471_v19 }
 0x783   :  { %v478_v23 = vadd.f32 %v477_v21, %v476_v22 }
 0x785   :  { %480 = vrot.lane.b32.xlu0 %v478_v23, %s1118_s3 }
 0x7f7   :  { %v481_v32 = vpop.permute.xlu0 %480 }
 0x7f8   :  { %483 = vst.msk [vmem:[%s1384_s5 + $0x10] sm:$0xff] %vm167_vm2, %v481_v32  ;;  %1034 = vmatmul.mubr.msk.f32.vlgmr.msra.gmra.mxu0 %vm167_vm2, %v481_v32 }
 0x7f9   :  { %1048 = vmatpush3.msra.mxu0 %v1153_v1  ;;  %1055 = vmatprep.mubr.msk.f32.mxu0 %vm1116_vm1, %v1115_v0 }
 0x7fa   :  { %1049 = vmatprep.subr.mxu0 %v1115_v0 }
 0x7fb   :  { %1050 = vmatpush3.msra.mxu0 %v1158_v2 }
 0x7fc   :  { %1051 = vmatprep.subr.mxu0 %v1115_v0 }
 0x7fd   :  { %1052 = vmatpush3.msra.mxu0 %v1174_v5 }
 0x7fe   :  { %1053 = vmatprep.subr.mxu0 %v1115_v0 }
 0x7ff   :  { %1054 = vmatpush3.msra.mxu0 %v1185_v7 }
 0x8b8   :  { %v552_v33 = vpop.f32.mrf.mxu0 }
 0x8b9   :  { %v563_v34 = vadd.f32 %v552_v33, %v1216_v10  ;;  %v556_v37 = vadd.f32 %v552_v33, %v139_v36 }
 0x8ba   :  { %v1035_v35 = vpop.f32.mrf.mxu0 }
 0x8bb   :  { %565 = vrot.lane.b32.xlu1 %v563_v34, %s1117_s6  ;;  %v919_v38 = vmul.f32 -1.442695, %v556_v37  ;;  %v154_v35 = vadd.f32 %v1223_v14, %v1309_v30 }
 0x8bd   :  { %1091 = vpow2.f32 %v919_v38 }
 0x8ca   :  { %v1092_v39 = vpop.eup %1091 }
 0x8cb   :  { %v560_v40 = vadd.f32 1.0, %v1092_v39 }
 0x8cd   :  { %1093 = vrcp.f32 %v560_v40 }
 0x8da   :  { %v1094_v41 = vpop.eup %1093 }
 0x8db   :  { %v575_v47 = vsub.f32 1.0, %v1094_v41  ;;  %v581_v49 = vmul.f32 %v1094_v41, %v478_v23 }
 0x92d   :  { %v566_v42 = vpop.permute.xlu1 %565 }
 0x92e   :  { %v568_v43 = vmul.f32 %v1094_v41, %v566_v42 }
 0x930   :  { %570 = vrot.lane.b32.xlu0 %v568_v43, %s1117_s6 }
 0x9a2   :  { %v571_v44 = vpop.permute.xlu0 %570 }
 0x9a3   :  { %v573_v45 = vadd.f32 %v571_v44, %v139_v36 }
 0x9a5   :  { %1095 = vtanh.f32 %v573_v45 }
 0x9b2   :  { %v1096_v46 = vpop.eup %1095 }
 0x9b3   :  { %577 = vrot.lane.b32.xlu1 %v1096_v46, %s1118_s3 }
 0xa25   :  { %v578_v48 = vpop.permute.xlu1 %577 }
 0xa26   :  { %v580_v50 = vmul.f32 %v578_v48, %v575_v47 }
 0xa28   :  { %v582_v51 = vadd.f32 %v581_v49, %v580_v50 }
 0xa2a   :  { %584 = vrot.lane.b32.xlu0 %v582_v51, %s1118_s3 }
 0xa9c   :  { %v585_v52 = vpop.permute.xlu0 %584 }
 0xa9d   :  { %587 = vst.msk [vmem:[%s1384_s5 + $0x18] sm:$0xff] %vm167_vm2, %v585_v52  ;;  %1045 = vmatmul.mubr.msk.f32.vlgmr.msra.gmra.mxu1 %vm167_vm2, %v585_v52 }
 0xa9e   :  { %1059 = vmatpush3.msra.mxu1 %v1153_v1  ;;  %1066 = vmatprep.mubr.msk.f32.mxu1 %vm1116_vm1, %v1115_v0  ;;  %v144_v1 = vadd.f32 %v1223_v14, %v143_v26 }
 0xa9f   :  { %1060 = vmatprep.subr.mxu1 %v1115_v0 }
 0xaa0   :  { %1061 = vmatpush3.msra.mxu1 %v1158_v2 }
 0xaa1   :  { %1062 = vmatprep.subr.mxu1 %v1115_v0 }
 0xaa2   :  { %1063 = vmatpush3.msra.mxu1 %v1174_v5 }
 0xaa3   :  { %1064 = vmatprep.subr.mxu1 %v1115_v0 }
 0xaa4   :  { %1065 = vmatpush3.msra.mxu1 %v1185_v7 }
 0xb5d   :  { %v656_v53 = vpop.f32.mrf.mxu1 }
 0xb5e   :  { %v667_v54 = vadd.f32 %v656_v53, %v1216_v10  ;;  %v660_v56 = vadd.f32 %v656_v53, %v144_v1 }
 0xb5f   :  { %v1046_v55 = vpop.f32.mrf.mxu1 }
 0xb60   :  { %669 = vrot.lane.b32.xlu1 %v667_v54, %s1117_s6  ;;  %v921_v57 = vmul.f32 -1.442695, %v660_v56 }
 0xb62   :  { %1097 = vpow2.f32 %v921_v57 }
 0xb6f   :  { %v1098_v2 = vpop.eup %1097 }
 0xb70   :  { %v664_v58 = vadd.f32 1.0, %v1098_v2 }
 0xb72   :  { %1099 = vrcp.f32 %v664_v58 }
 0xb7f   :  { %v1100_v59 = vpop.eup %1099 }
 0xb80   :  { %v679_v62 = vsub.f32 1.0, %v1100_v59  ;;  %v685_v3 = vmul.f32 %v1100_v59, %v582_v51 }
 0xbd2   :  { %v670_v5 = vpop.permute.xlu1 %669 }
 0xbd3   :  { %v672_v60 = vmul.f32 %v1100_v59, %v670_v5 }
 0xbd5   :  { %674 = vrot.lane.b32.xlu0 %v672_v60, %s1117_s6 }
 0xc47   :  { %v675_v0 = vpop.permute.xlu0 %674 }
 0xc48   :  { %v677_v7 = vadd.f32 %v675_v0, %v144_v1 }
 0xc4a   :  { %1101 = vtanh.f32 %v677_v7 }
 0xc57   :  { %v1102_v61 = vpop.eup %1101 }
 0xc58   :  { %681 = vrot.lane.b32.xlu1 %v1102_v61, %s1118_s3 }
 0xcca   :  { %v682_v63 = vpop.permute.xlu1 %681 }
 0xccb   :  { %v684_v4 = vmul.f32 %v682_v63, %v679_v62 }
 0xccd   :  { %v686_v6 = vadd.f32 %v685_v3, %v684_v4 }
 0xccf   :  { %688 = vrot.lane.b32.xlu0 %v686_v6, %s1118_s3 }
 0xd41   :  { %v689_v8 = vpop.permute.xlu0 %688 }
 0xd42   :  { %691 = vst.msk [vmem:[%s1384_s5 + $0x20] sm:$0xff] %vm167_vm2, %v689_v8  ;;  %1056 = vmatmul.mubr.msk.f32.vlgmr.msra.gmra.mxu0 %vm167_vm2, %v689_v8 }
 0xe02   :  { %v760_v9 = vpop.f32.mrf.mxu0 }
 0xe03   :  { %v771_v11 = vadd.f32 %v760_v9, %v1216_v10  ;;  %v764_v15 = vadd.f32 %v760_v9, %v149_v13 }
 0xe04   :  { %v1057_v12 = vpop.f32.mrf.mxu0 }
 0xe05   :  { %773 = vrot.lane.b32.xlu1 %v771_v11, %s1117_s6  ;;  %v923_v16 = vmul.f32 -1.442695, %v764_v15 }
 0xe07   :  { %1103 = vpow2.f32 %v923_v16 }
 0xe14   :  { %v1104_v17 = vpop.eup %1103 }
 0xe15   :  { %v768_v18 = vadd.f32 1.0, %v1104_v17 }
 0xe17   :  { %1105 = vrcp.f32 %v768_v18 }
 0xe24   :  { %v1106_v19 = vpop.eup %1105 }
 0xe25   :  { %v783_v25 = vsub.f32 1.0, %v1106_v19  ;;  %v789_v27 = vmul.f32 %v1106_v19, %v686_v6 }
 0xe77   :  { %v774_v20 = vpop.permute.xlu1 %773 }
 0xe78   :  { %v776_v21 = vmul.f32 %v1106_v19, %v774_v20 }
 0xe7a   :  { %778 = vrot.lane.b32.xlu0 %v776_v21, %s1117_s6 }
 0xeec   :  { %v779_v22 = vpop.permute.xlu0 %778 }
 0xeed   :  { %v781_v23 = vadd.f32 %v779_v22, %v149_v13 }
 0xeef   :  { %1107 = vtanh.f32 %v781_v23 }
 0xefc   :  { %v1108_v24 = vpop.eup %1107 }
 0xefd   :  { %785 = vrot.lane.b32.xlu1 %v1108_v24, %s1118_s3 }
 0xf6f   :  { %v786_v26 = vpop.permute.xlu1 %785 }
 0xf70   :  { %v788_v28 = vmul.f32 %v786_v26, %v783_v25 }
 0xf72   :  { %v790_v29 = vadd.f32 %v789_v27, %v788_v28 }
 0xf74   :  { %792 = vrot.lane.b32.xlu0 %v790_v29, %s1118_s3 }
 0xfe6   :  { %v793_v31 = vpop.permute.xlu0 %792 }
 0xfe7   :  { %795 = vst.msk [vmem:[%s1384_s5 + $0x28] sm:$0xff] %vm167_vm2, %v793_v31  ;;  %1067 = vmatmul.mubr.msk.f32.vlgmr.msra.gmra.mxu1 %vm167_vm2, %v793_v31 }
0x10a7   :  { %v864_v32 = vpop.f32.mrf.mxu1 }
0x10a8   :  { %v875_v33 = vadd.f32 %v864_v32, %v1216_v10  ;;  %v868_v36 = vadd.f32 %v864_v32, %v154_v35 }
0x10a9   :  { %v1068_v34 = vpop.f32.mrf.mxu1 }
0x10aa   :  { %877 = vrot.lane.b32.xlu1 %v875_v33, %s1117_s6  ;;  %v925_v37 = vmul.f32 -1.442695, %v868_v36 }
0x10ac   :  { %1109 = vpow2.f32 %v925_v37 }
0x10b9   :  { %v1110_v38 = vpop.eup %1109 }
0x10ba   :  { %v872_v39 = vadd.f32 1.0, %v1110_v38 }
0x10bc   :  { %1111 = vrcp.f32 %v872_v39 }
0x10c9   :  { %v1112_v40 = vpop.eup %1111 }
0x10ca   :  { %v887_v45 = vsub.f32 1.0, %v1112_v40  ;;  %v893_v14 = vmul.f32 %v1112_v40, %v790_v29 }
0x111c   :  { %v878_v41 = vpop.permute.xlu1 %877 }
0x111d   :  { %v880_v42 = vmul.f32 %v1112_v40, %v878_v41 }
0x111f   :  { %882 = vrot.lane.b32.xlu0 %v880_v42, %s1117_s6 }
0x1191   :  { %v883_v43 = vpop.permute.xlu0 %882 }
0x1192   :  { %v885_v44 = vadd.f32 %v883_v43, %v154_v35 }
0x1194   :  { %1113 = vtanh.f32 %v885_v44 }
0x11a1   :  { %v1114_v10 = vpop.eup %1113 }
0x11a2   :  { %889 = vrot.lane.b32.xlu1 %v1114_v10, %s1118_s3 }
0x1214   :  { %v890_v46 = vpop.permute.xlu1 %889 }
0x1215   :  { %v892_v30 = vmul.f32 %v890_v46, %v887_v45 }
0x1217   :  { %v894_v47 = vadd.f32 %v893_v14, %v892_v30 }
0x1219   :  { %896 = vrot.lane.b32.xlu0 %v894_v47, %s1118_s3 }
0x128b   :  { %v897_v48 = vpop.permute.xlu0 %896 }
0x128c   :  { %899 = vst.msk [vmem:[%s1384_s5 + $0x30] sm:$0xff] %vm167_vm2, %v897_v48 }

</bundles_post_ra>
